<compile_context>
chip_gen: v7x
topology: tpu7x:2x2x1
jax: 0.10.0
libtpu: 0.0.40
codegen_flags: <defaults>
</compile_context>

<pallas_src>
import jax
import jax.numpy as jnp
from jax.experimental import pallas as pl
from jax.experimental.pallas import tpu as pltpu


def _scale_mul_kernel(scale_ref, x_ref, o_ref):
    # scale_ref: (TR, 1), x_ref/o_ref: (TR, HW).
    # (TR, 1) operand is lane-broadcast for free -> one VPU multiply per vreg.
    o_ref[...] = x_ref[...] * scale_ref[...]


def _num_tensorcores():
    """Best-effort TensorCores-per-chip (2 on v7x, 1 on v5e/v6e). Safe default 1."""
    try:
        info = pltpu.get_tpu_info()
        for attr in ("num_tensorcores", "tensorcores_per_chip", "num_cores",
                     "core_count"):
            v = getattr(info, attr, None)
            if isinstance(v, int) and v > 0:
                return v
    except Exception:
        pass
    try:
        dev = jax.devices()[0]
        v = getattr(dev, "num_cores", None)
        if isinstance(v, int) and v > 0:
            return v
        if "v7" in dev.device_kind.lower():
            return 2
    except Exception:
        pass
    return 1


def channel_scale_mul(x148, x143, *, num_blocks=None, donate_activation=False):
    """x148: (N, C, 1, 1), x143: (N, C, H, W) -> (N, C, H, W) = x148 * x143."""
    n, c, h, w = x143.shape
    assert x148.shape == (n, c, 1, 1)

    rows = n * c          # sublane axis = (batch, channel)
    hw = h * w            # lane axis = spatial
    x2d = x143.reshape(rows, hw)
    # Match the activation dtype up front (avoids promote->downcast on store);
    # do NOT pre-broadcast to (rows, hw) — that would add 50% HBM read traffic.
    s2d = x148.reshape(rows, 1).astype(x143.dtype)

    if num_blocks is None:
        num_blocks = _num_tensorcores()
    # Fall back to one whole-array block if the split does not tile cleanly.
    if num_blocks <= 0 or rows % num_blocks != 0 or (rows // num_blocks) % 8 != 0:
        num_blocks = 1
    tr = rows // num_blocks

    itemsize = jnp.dtype(x143.dtype).itemsize
    cost = pl.CostEstimate(
        flops=rows * hw,
        transcendentals=0,
        bytes_accessed=(2 * rows * hw + rows) * itemsize,
    )

    out2d = pl.pallas_call(
        _scale_mul_kernel,
        out_shape=jax.ShapeDtypeStruct((rows, hw), x143.dtype),
        grid_spec=pltpu.PrefetchScalarGridSpec(
            num_scalar_prefetch=0,
            grid=(num_blocks,),
            in_specs=[
                pl.BlockSpec((tr, 1), lambda i: (i, 0)),    # scale: one small DMA per block
                pl.BlockSpec((tr, hw), lambda i: (i, 0)),   # activation: one big VMEM tile
            ],
            out_specs=pl.BlockSpec((tr, hw), lambda i: (i, 0)),
        ),
        compiler_params=pltpu.CompilerParams(
            dimension_semantics=("parallel",),
        ),
        cost_estimate=cost,
        # Alias activation -> output only when the caller guarantees x143 is dead.
        input_output_aliases={1: 0} if donate_activation else {},
    )(s2d, x2d)

    return out2d.reshape(n, c, h, w)


if __name__ == "__main__":
    key = jax.random.PRNGKey(0)
    k1, k2 = jax.random.split(key)

    # Shapes from the module's forward (already small: ~451 KB activation).
    x143 = jax.random.normal(k1, (1, 576, 14, 14), dtype=jnp.float32)
    x148 = jax.random.normal(k2, (1, 576, 1, 1), dtype=jnp.float32)

    out = channel_scale_mul(x148, x143)
    jax.block_until_ready(out)

    # Verify against plain JAX broadcast multiply.
    ref = x148 * x143
    assert out.shape == ref.shape == (1, 576, 14, 14)
    assert jnp.allclose(out, ref, atol=1e-6, rtol=1e-6)

    print("KERNEL_OK")
</pallas_src>

<mosaic_0001>
module attributes {stable_mosaic.version = 11 : i64} {
  func.func @_scale_mul_kernel(%arg0: i32, %arg1: memref<576x1xf32, #tpu.memory_space<vmem>>, %arg2: memref<576x196xf32, #tpu.memory_space<vmem>>, %arg3: memref<576x196xf32, #tpu.memory_space<vmem>>) attributes {dimension_semantics = [#tpu.dimension_semantics<parallel>], iteration_bounds = array<i64: 1>, scalar_prefetch = 0 : i64, scratch_operands = 0 : i64, tpu.core_type = #tpu.core_type<tc>, window_params = [{transform_indices = @transform_0, window_bounds = array<i64: 576, 1>}, {transform_indices = @transform_1, window_bounds = array<i64: 576, 196>}, {transform_indices = @transform_2, window_bounds = array<i64: 576, 196>}]} {
    %c0 = arith.constant 0 : index
    %c0_0 = arith.constant 0 : index
    %0 = vector.load %arg2[%c0, %c0_0] : memref<576x196xf32, #tpu.memory_space<vmem>>, vector<576x196xf32>
    %c0_1 = arith.constant 0 : index
    %c0_2 = arith.constant 0 : index
    %1 = vector.load %arg1[%c0_1, %c0_2] : memref<576x1xf32, #tpu.memory_space<vmem>>, vector<576x1xf32>
    %2 = vector.broadcast %1 : vector<576x1xf32> to vector<576x196xf32>
    %3 = arith.mulf %0, %2 : vector<576x196xf32>
    %c0_3 = arith.constant 0 : index
    %c0_4 = arith.constant 0 : index
    %4 = vector.load %arg3[%c0_3, %c0_4] : memref<576x196xf32, #tpu.memory_space<vmem>>, vector<576x196xf32>
    tpu.vector_store %arg3[%c0_3, %c0_4], %3 {strides = array<i32>} : memref<576x196xf32, #tpu.memory_space<vmem>>, vector<576x196xf32>,
    return
  }
  func.func @transform_0(%arg0: i32) -> (i32, i32) {
    %c0_i32 = arith.constant 0 : i32
    %c0_i32_0 = arith.constant 0 : i32
    return %arg0, %c0_i32 : i32, i32
  }
  func.func @transform_1(%arg0: i32) -> (i32, i32) {
    %c0_i32 = arith.constant 0 : i32
    %c0_i32_0 = arith.constant 0 : i32
    return %arg0, %c0_i32 : i32, i32
  }
  func.func @transform_2(%arg0: i32) -> (i32, i32) {
    %c0_i32 = arith.constant 0 : i32
    %c0_i32_0 = arith.constant 0 : i32
    return %arg0, %c0_i32 : i32, i32
  }
}

</mosaic_0001>

<bundles_post_ra>
// kernel: tpu_custom_call.1
= control target key start
LH: loop header
LB: loop body
LE: loop exit
PB: predicated region body
PF: predicated region fallthrough
CT: control target
= control target key end

     0   :  { %v883_v0 = vmov 0   ;;  %vm732_vm0 = vcmask 556032   ;;  %s2051_s0 = inlined_call_operand.vmem [shape: f32[576,1], index: 0, kind: input, shape index: {}]   ;;  %s2052_s1 = inlined_call_operand.vmem [shape: f32[576,196], index: 1, kind: input, shape index: {}]   ;;  %s2053_s2 = inlined_call_operand.vmem [shape: f32[576,196], index: 2, kind: output, shape index: {}]  }
   0x1   :  { %882 = vset.pattern.permute.xlu1 %v883_v0  ;;  %881 = vset.pattern.permute.xlu0 %v883_v0  ;;  %v157_v1 = vld [vmem:[%s2051_s0 + $0x10] sm:$0xff]  ;;  %v155_v2 = vld [vmem:[%s2051_s0] sm:$0xff]  ;;  %v158_v3 = vld [vmem:[%s2051_s0 + $0x18] sm:$0xff] }
   0x2   :  { %239 = vperm.xlu1 %882, %v157_v1   ;;  %229 = vperm.xlu0 %881, %v155_v2   ;;  %v156_v4 = vld [vmem:[%s2051_s0 + $0x8] sm:$0xff]  ;;  %v159_v6 = vld [vmem:[%s2051_s0 + $0x20] sm:$0xff]  ;;  %v162_v7 = vld [vmem:[%s2051_s0 + $0x38] sm:$0xff] }
   0x3   :  { %v160_v5 = vld [vmem:[%s2051_s0 + $0x28] sm:$0xff]  ;;  %v161_v8 = vld [vmem:[%s2051_s0 + $0x30] sm:$0xff]  ;;  %v163_v10 = vld [vmem:[%s2051_s0 + $0x40] sm:$0xff] }
   0x4   :  { %v164_v9 = vld [vmem:[%s2051_s0 + $0x48] sm:$0xff]  ;;  %v166_v11 = vld [vmem:[%s2051_s0 + $0x58] sm:$0xff]  ;;  %v165_v12 = vld [vmem:[%s2051_s0 + $0x50] sm:$0xff] }
   0x5   :  { %v168_v13 = vld [vmem:[%s2051_s0 + $0x68] sm:$0xff]  ;;  %v167_v14 = vld [vmem:[%s2051_s0 + $0x60] sm:$0xff]  ;;  %v170_v15 = vld [vmem:[%s2051_s0 + $0x78] sm:$0xff] }
   0x6   :  { %244 = vperm.xlu1 %882, %v158_v3   ;;  %234 = vperm.xlu0 %881, %v156_v4   ;;  %v169_v16 = vld [vmem:[%s2051_s0 + $0x70] sm:$0xff]  ;;  %v172_v17 = vld [vmem:[%s2051_s0 + $0x88] sm:$0xff]  ;;  %v171_v18 = vld [vmem:[%s2051_s0 + $0x80] sm:$0xff] }
   0x7   :  { %v174_v19 = vld [vmem:[%s2051_s0 + $0x98] sm:$0xff]  ;;  %v173_v20 = vld [vmem:[%s2051_s0 + $0x90] sm:$0xff]  ;;  %v176_v21 = vld [vmem:[%s2051_s0 + $0xa8] sm:$0xff] }
   0x8   :  { %v175_v22 = vld [vmem:[%s2051_s0 + $0xa0] sm:$0xff]  ;;  %v178_v23 = vld [vmem:[%s2051_s0 + $0xb8] sm:$0xff]  ;;  %v177_v24 = vld [vmem:[%s2051_s0 + $0xb0] sm:$0xff] }
   0x9   :  { %v180_v25 = vld [vmem:[%s2051_s0 + $0xc8] sm:$0xff]  ;;  %v179_v26 = vld [vmem:[%s2051_s0 + $0xc0] sm:$0xff]  ;;  %v182_v27 = vld [vmem:[%s2051_s0 + $0xd8] sm:$0xff] }
   0xa   :  { %254 = vperm.xlu1 %882, %v160_v5   ;;  %249 = vperm.xlu0 %881, %v159_v6   ;;  %v181_v28 = vld [vmem:[%s2051_s0 + $0xd0] sm:$0xff]  ;;  %v184_v29 = vld [vmem:[%s2051_s0 + $0xe8] sm:$0xff]  ;;  %v183_v30 = vld [vmem:[%s2051_s0 + $0xe0] sm:$0xff] }
   0xb   :  { %v186_v31 = vld [vmem:[%s2051_s0 + $0xf8] sm:$0xff]  ;;  %v185_v32 = vld [vmem:[%s2051_s0 + $0xf0] sm:$0xff]  ;;  %v188_v33 = vld [vmem:[%s2051_s0 + $0x108] sm:$0xff] }
   0xc   :  { %v187_v34 = vld [vmem:[%s2051_s0 + $0x100] sm:$0xff]  ;;  %v190_v35 = vld [vmem:[%s2051_s0 + $0x118] sm:$0xff]  ;;  %v189_v36 = vld [vmem:[%s2051_s0 + $0x110] sm:$0xff] }
   0xd   :  { %v192_v37 = vld [vmem:[%s2051_s0 + $0x128] sm:$0xff]  ;;  %v191_v38 = vld [vmem:[%s2051_s0 + $0x120] sm:$0xff]  ;;  %v194_v39 = vld [vmem:[%s2051_s0 + $0x138] sm:$0xff] }
   0xe   :  { %264 = vperm.xlu1 %882, %v162_v7   ;;  %259 = vperm.xlu0 %881, %v161_v8   ;;  %v193_v40 = vld [vmem:[%s2051_s0 + $0x130] sm:$0xff]  ;;  %v196_v41 = vld [vmem:[%s2051_s0 + $0x148] sm:$0xff]  ;;  %v195_v42 = vld [vmem:[%s2051_s0 + $0x140] sm:$0xff] }
   0xf   :  { %v198_v43 = vld [vmem:[%s2051_s0 + $0x158] sm:$0xff]  ;;  %v197_v44 = vld [vmem:[%s2051_s0 + $0x150] sm:$0xff]  ;;  %v200_v45 = vld [vmem:[%s2051_s0 + $0x168] sm:$0xff] }
  0x10   :  { %v199_v46 = vld [vmem:[%s2051_s0 + $0x160] sm:$0xff]  ;;  %v202_v47 = vld [vmem:[%s2051_s0 + $0x178] sm:$0xff]  ;;  %v201_v48 = vld [vmem:[%s2051_s0 + $0x170] sm:$0xff] }
  0x11   :  { %v204_v49 = vld [vmem:[%s2051_s0 + $0x188] sm:$0xff]  ;;  %v203_v50 = vld [vmem:[%s2051_s0 + $0x180] sm:$0xff]  ;;  %v206_v51 = vld [vmem:[%s2051_s0 + $0x198] sm:$0xff] }
  0x12   :  { %274 = vperm.xlu1 %882, %v164_v9   ;;  %269 = vperm.xlu0 %881, %v163_v10   ;;  %v205_v52 = vld [vmem:[%s2051_s0 + $0x190] sm:$0xff]  ;;  %v208_v53 = vld [vmem:[%s2051_s0 + $0x1a8] sm:$0xff]  ;;  %v207_v54 = vld [vmem:[%s2051_s0 + $0x1a0] sm:$0xff] }
  0x13   :  { %v210_v55 = vld [vmem:[%s2051_s0 + $0x1b8] sm:$0xff]  ;;  %v209_v56 = vld [vmem:[%s2051_s0 + $0x1b0] sm:$0xff]  ;;  %v212_v57 = vld [vmem:[%s2051_s0 + $0x1c8] sm:$0xff] }
  0x14   :  { %v211_v58 = vld [vmem:[%s2051_s0 + $0x1c0] sm:$0xff]  ;;  %v214_v59 = vld [vmem:[%s2051_s0 + $0x1d8] sm:$0xff]  ;;  %v213_v60 = vld [vmem:[%s2051_s0 + $0x1d0] sm:$0xff] }
  0x15   :  { %v216_v61 = vld [vmem:[%s2051_s0 + $0x1e8] sm:$0xff]  ;;  %v215_v62 = vld [vmem:[%s2051_s0 + $0x1e0] sm:$0xff]  ;;  %v218_v63 = vld [vmem:[%s2051_s0 + $0x1f8] sm:$0xff] }
  0x16   :  { %284 = vperm.xlu1 %882, %v166_v11   ;;  %279 = vperm.xlu0 %881, %v165_v12   ;;  %v217_v0 = vld [vmem:[%s2051_s0 + $0x1f0] sm:$0xff]  ;;  %v15_v1 = vld [vmem:[%s2052_s1 + $0x20] sm:$0xff]  ;;  %v16_v2 = vld [vmem:[%s2052_s1 + $0x28] sm:$0xff] }
  0x17   :  { %v11_v3 = vld [vmem:[%s2052_s1] sm:$0xff]  ;;  %v12_v4 = vld [vmem:[%s2052_s1 + $0x8] sm:$0xff] }
  0x18   :  { %v220_v5 = vld [vmem:[%s2051_s0 + $0x208] sm:$0xff]  ;;  %v219_v6 = vld [vmem:[%s2051_s0 + $0x200] sm:$0xff] }
  0x1a   :  { %294 = vperm.xlu1 %882, %v168_v13   ;;  %289 = vperm.xlu0 %881, %v167_v14   ;;  %v17_v13 = vld [vmem:[%s2052_s1 + $0x30] sm:$0xff]  ;;  %v18_v14 = vld [vmem:[%s2052_s1 + $0x38] sm:$0xff] }
  0x1e   :  { %304 = vperm.xlu1 %882, %v170_v15   ;;  %299 = vperm.xlu0 %881, %v169_v16   ;;  %v13_v15 = vld [vmem:[%s2052_s1 + $0x10] sm:$0xff]  ;;  %v14_v16 = vld [vmem:[%s2052_s1 + $0x18] sm:$0xff] }
  0x22   :  { %314 = vperm.xlu1 %882, %v172_v17   ;;  %309 = vperm.xlu0 %881, %v171_v18   ;;  %v222_v17 = vld [vmem:[%s2051_s0 + $0x218] sm:$0xff]  ;;  %v221_v18 = vld [vmem:[%s2051_s0 + $0x210] sm:$0xff] }
  0x26   :  { %324 = vperm.xlu1 %882, %v174_v19   ;;  %319 = vperm.xlu0 %881, %v173_v20  }
  0x2a   :  { %334 = vperm.xlu1 %882, %v176_v21   ;;  %329 = vperm.xlu0 %881, %v175_v22  }
  0x2e   :  { %344 = vperm.xlu1 %882, %v178_v23   ;;  %339 = vperm.xlu0 %881, %v177_v24  }
  0x32   :  { %354 = vperm.xlu1 %882, %v180_v25   ;;  %349 = vperm.xlu0 %881, %v179_v26   ;;  %v21_v25 = vld [vmem:[%s2052_s1 + $0x50] sm:$0xff]  ;;  %v22_v26 = vld [vmem:[%s2052_s1 + $0x58] sm:$0xff] }
  0x36   :  { %364 = vperm.xlu1 %882, %v182_v27   ;;  %359 = vperm.xlu0 %881, %v181_v28   ;;  %v19_v27 = vld [vmem:[%s2052_s1 + $0x40] sm:$0xff]  ;;  %v20_v28 = vld [vmem:[%s2052_s1 + $0x48] sm:$0xff] }
  0x3a   :  { %374 = vperm.xlu1 %882, %v184_v29   ;;  %369 = vperm.xlu0 %881, %v183_v30   ;;  %v224_v29 = vld [vmem:[%s2051_s0 + $0x228] sm:$0xff]  ;;  %v223_v30 = vld [vmem:[%s2051_s0 + $0x220] sm:$0xff] }
  0x3e   :  { %384 = vperm.xlu1 %882, %v186_v31   ;;  %379 = vperm.xlu0 %881, %v185_v32  }
  0x42   :  { %394 = vperm.xlu1 %882, %v188_v33   ;;  %389 = vperm.xlu0 %881, %v187_v34  }
  0x46   :  { %404 = vperm.xlu1 %882, %v190_v35   ;;  %399 = vperm.xlu0 %881, %v189_v36  }
  0x4a   :  { %414 = vperm.xlu1 %882, %v192_v37   ;;  %409 = vperm.xlu0 %881, %v191_v38   ;;  %v25_v37 = vld [vmem:[%s2052_s1 + $0x70] sm:$0xff]  ;;  %v26_v38 = vld [vmem:[%s2052_s1 + $0x78] sm:$0xff] }
  0x4e   :  { %424 = vperm.xlu1 %882, %v194_v39   ;;  %419 = vperm.xlu0 %881, %v193_v40   ;;  %v23_v39 = vld [vmem:[%s2052_s1 + $0x60] sm:$0xff]  ;;  %v24_v40 = vld [vmem:[%s2052_s1 + $0x68] sm:$0xff] }
  0x52   :  { %434 = vperm.xlu1 %882, %v196_v41   ;;  %429 = vperm.xlu0 %881, %v195_v42   ;;  %v226_v41 = vld [vmem:[%s2051_s0 + $0x238] sm:$0xff]  ;;  %v225_v42 = vld [vmem:[%s2051_s0 + $0x230] sm:$0xff] }
  0x56   :  { %444 = vperm.xlu1 %882, %v198_v43   ;;  %439 = vperm.xlu0 %881, %v197_v44  }
  0x5a   :  { %454 = vperm.xlu1 %882, %v200_v45   ;;  %449 = vperm.xlu0 %881, %v199_v46  }
  0x5e   :  { %464 = vperm.xlu1 %882, %v202_v47   ;;  %459 = vperm.xlu0 %881, %v201_v48  }
  0x62   :  { %474 = vperm.xlu1 %882, %v204_v49   ;;  %469 = vperm.xlu0 %881, %v203_v50   ;;  %v29_v49 = vld [vmem:[%s2052_s1 + $0x90] sm:$0xff]  ;;  %v30_v50 = vld [vmem:[%s2052_s1 + $0x98] sm:$0xff] }
  0x66   :  { %484 = vperm.xlu1 %882, %v206_v51   ;;  %479 = vperm.xlu0 %881, %v205_v52   ;;  %v27_v51 = vld [vmem:[%s2052_s1 + $0x80] sm:$0xff]  ;;  %v28_v52 = vld [vmem:[%s2052_s1 + $0x88] sm:$0xff] }
  0x6a   :  { %494 = vperm.xlu1 %882, %v208_v53   ;;  %489 = vperm.xlu0 %881, %v207_v54  }
  0x6e   :  { %504 = vperm.xlu1 %882, %v210_v55   ;;  %499 = vperm.xlu0 %881, %v209_v56  }
  0x72   :  { %514 = vperm.xlu1 %882, %v212_v57   ;;  %509 = vperm.xlu0 %881, %v211_v58  }
  0x76   :  { %524 = vperm.xlu1 %882, %v214_v59   ;;  %519 = vperm.xlu0 %881, %v213_v60   ;;  %v33_v59 = vld [vmem:[%s2052_s1 + $0xb0] sm:$0xff]  ;;  %v34_v60 = vld [vmem:[%s2052_s1 + $0xb8] sm:$0xff] }
  0x7a   :  { %534 = vperm.xlu1 %882, %v216_v61   ;;  %529 = vperm.xlu0 %881, %v215_v62   ;;  %v31_v61 = vld [vmem:[%s2052_s1 + $0xa0] sm:$0xff]  ;;  %v32_v62 = vld [vmem:[%s2052_s1 + $0xa8] sm:$0xff] }
  0x7e   :  { %544 = vperm.xlu1 %882, %v218_v63   ;;  %539 = vperm.xlu0 %881, %v217_v0  }
  0x81   :  { %v240_v7 = vpop.permute.xlu1 %239  ;;  %v230_v8 = vpop.permute.xlu0 %229 }
  0x82   :  { %v591_v9 = vmul.f32 %v240_v7, %v15_v1  ;;  %v592_v10 = vmul.f32 %v240_v7, %v16_v2  ;;  %v587_v11 = vmul.f32 %v230_v8, %v11_v3  ;;  %v588_v12 = vmul.f32 %v230_v8, %v12_v4  ;;  %554 = vperm.xlu1 %882, %v220_v5   ;;  %v37_v5 = vld [vmem:[%s2052_s1 + $0xd0] sm:$0xff]  ;;  %v35_v7 = vld [vmem:[%s2052_s1 + $0xc0] sm:$0xff]  ;;  %v36_v8 = vld [vmem:[%s2052_s1 + $0xc8] sm:$0xff] }
  0x83   :  { %549 = vperm.xlu0 %881, %v219_v6   ;;  %v38_v6 = vld [vmem:[%s2052_s1 + $0xd8] sm:$0xff] }
  0x84   :  { %736 = vst [vmem:[%s2053_s2 + $0x20] sm:$0xff] %v591_v9  ;;  %737 = vst.msk [vmem:[%s2053_s2 + $0x28] sm:$0xff] %vm732_vm0, %v592_v10 }
  0x85   :  { %731 = vst [vmem:[%s2053_s2] sm:$0xff] %v587_v11  ;;  %733 = vst.msk [vmem:[%s2053_s2 + $0x8] sm:$0xff] %vm732_vm0, %v588_v12  ;;  %v245_v19 = vpop.permute.xlu1 %244  ;;  %v235_v20 = vpop.permute.xlu0 %234 }
  0x86   :  { %v593_v21 = vmul.f32 %v245_v19, %v17_v13  ;;  %v594_v22 = vmul.f32 %v245_v19, %v18_v14  ;;  %v589_v23 = vmul.f32 %v235_v20, %v13_v15  ;;  %v590_v24 = vmul.f32 %v235_v20, %v14_v16  ;;  %564 = vperm.xlu1 %882, %v222_v17   ;;  %v41_v15 = vld [vmem:[%s2052_s1 + $0xf0] sm:$0xff]  ;;  %v42_v16 = vld [vmem:[%s2052_s1 + $0xf8] sm:$0xff]  ;;  %v39_v17 = vld [vmem:[%s2052_s1 + $0xe0] sm:$0xff] }
  0x87   :  { %559 = vperm.xlu0 %881, %v221_v18   ;;  %v40_v18 = vld [vmem:[%s2052_s1 + $0xe8] sm:$0xff] }
  0x88   :  { %738 = vst [vmem:[%s2053_s2 + $0x30] sm:$0xff] %v593_v21  ;;  %739 = vst.msk [vmem:[%s2053_s2 + $0x38] sm:$0xff] %vm732_vm0, %v594_v22 }
  0x89   :  { %734 = vst [vmem:[%s2053_s2 + $0x10] sm:$0xff] %v589_v23  ;;  %735 = vst.msk [vmem:[%s2053_s2 + $0x18] sm:$0xff] %vm732_vm0, %v590_v24  ;;  %v255_v31 = vpop.permute.xlu1 %254  ;;  %v250_v32 = vpop.permute.xlu0 %249 }
  0x8a   :  { %v597_v33 = vmul.f32 %v255_v31, %v21_v25  ;;  %v598_v34 = vmul.f32 %v255_v31, %v22_v26  ;;  %v595_v35 = vmul.f32 %v250_v32, %v19_v27  ;;  %v596_v36 = vmul.f32 %v250_v32, %v20_v28  ;;  %574 = vperm.xlu1 %882, %v224_v29   ;;  %v45_v25 = vld [vmem:[%s2052_s1 + $0x110] sm:$0xff]  ;;  %v46_v26 = vld [vmem:[%s2052_s1 + $0x118] sm:$0xff]  ;;  %v43_v27 = vld [vmem:[%s2052_s1 + $0x100] sm:$0xff] }
  0x8b   :  { %569 = vperm.xlu0 %881, %v223_v30   ;;  %v44_v28 = vld [vmem:[%s2052_s1 + $0x108] sm:$0xff] }
  0x8c   :  { %742 = vst [vmem:[%s2053_s2 + $0x50] sm:$0xff] %v597_v33  ;;  %743 = vst.msk [vmem:[%s2053_s2 + $0x58] sm:$0xff] %vm732_vm0, %v598_v34 }
  0x8d   :  { %740 = vst [vmem:[%s2053_s2 + $0x40] sm:$0xff] %v595_v35  ;;  %741 = vst.msk [vmem:[%s2053_s2 + $0x48] sm:$0xff] %vm732_vm0, %v596_v36  ;;  %v265_v43 = vpop.permute.xlu1 %264  ;;  %v260_v44 = vpop.permute.xlu0 %259  ;;  %v49_v35 = vld [vmem:[%s2052_s1 + $0x130] sm:$0xff]  ;;  %v50_v36 = vld [vmem:[%s2052_s1 + $0x138] sm:$0xff] }
  0x8e   :  { %v601_v45 = vmul.f32 %v265_v43, %v25_v37  ;;  %v602_v46 = vmul.f32 %v265_v43, %v26_v38  ;;  %v599_v47 = vmul.f32 %v260_v44, %v23_v39  ;;  %v600_v48 = vmul.f32 %v260_v44, %v24_v40  ;;  %584 = vperm.xlu1 %882, %v226_v41   ;;  %v47_v37 = vld [vmem:[%s2052_s1 + $0x120] sm:$0xff]  ;;  %v48_v38 = vld [vmem:[%s2052_s1 + $0x128] sm:$0xff] }
  0x8f   :  { %579 = vperm.xlu0 %881, %v225_v42  }
  0x90   :  { %746 = vst [vmem:[%s2053_s2 + $0x70] sm:$0xff] %v601_v45  ;;  %747 = vst.msk [vmem:[%s2053_s2 + $0x78] sm:$0xff] %vm732_vm0, %v602_v46  ;;  %v53_v45 = vld [vmem:[%s2052_s1 + $0x150] sm:$0xff]  ;;  %v54_v46 = vld [vmem:[%s2052_s1 + $0x158] sm:$0xff] }
  0x91   :  { %744 = vst [vmem:[%s2053_s2 + $0x60] sm:$0xff] %v599_v47  ;;  %745 = vst.msk [vmem:[%s2053_s2 + $0x68] sm:$0xff] %vm732_vm0, %v600_v48  ;;  %v275_v53 = vpop.permute.xlu1 %274  ;;  %v270_v54 = vpop.permute.xlu0 %269  ;;  %v51_v47 = vld [vmem:[%s2052_s1 + $0x140] sm:$0xff]  ;;  %v52_v48 = vld [vmem:[%s2052_s1 + $0x148] sm:$0xff] }
  0x92   :  { %v605_v55 = vmul.f32 %v275_v53, %v29_v49  ;;  %v606_v56 = vmul.f32 %v275_v53, %v30_v50  ;;  %v603_v57 = vmul.f32 %v270_v54, %v27_v51  ;;  %v604_v58 = vmul.f32 %v270_v54, %v28_v52 }
  0x94   :  { %750 = vst [vmem:[%s2053_s2 + $0x90] sm:$0xff] %v605_v55  ;;  %751 = vst.msk [vmem:[%s2053_s2 + $0x98] sm:$0xff] %vm732_vm0, %v606_v56  ;;  %v57_v55 = vld [vmem:[%s2052_s1 + $0x170] sm:$0xff]  ;;  %v58_v56 = vld [vmem:[%s2052_s1 + $0x178] sm:$0xff] }
  0x95   :  { %748 = vst [vmem:[%s2053_s2 + $0x80] sm:$0xff] %v603_v57  ;;  %749 = vst.msk [vmem:[%s2053_s2 + $0x88] sm:$0xff] %vm732_vm0, %v604_v58  ;;  %v285_v63 = vpop.permute.xlu1 %284  ;;  %v280_v0 = vpop.permute.xlu0 %279  ;;  %v55_v57 = vld [vmem:[%s2052_s1 + $0x160] sm:$0xff]  ;;  %v56_v58 = vld [vmem:[%s2052_s1 + $0x168] sm:$0xff] }
  0x96   :  { %v609_v1 = vmul.f32 %v285_v63, %v33_v59  ;;  %v610_v2 = vmul.f32 %v285_v63, %v34_v60  ;;  %v607_v3 = vmul.f32 %v280_v0, %v31_v61  ;;  %v608_v4 = vmul.f32 %v280_v0, %v32_v62 }
  0x98   :  { %754 = vst [vmem:[%s2053_s2 + $0xb0] sm:$0xff] %v609_v1  ;;  %755 = vst.msk [vmem:[%s2053_s2 + $0xb8] sm:$0xff] %vm732_vm0, %v610_v2  ;;  %v61_v1 = vld [vmem:[%s2052_s1 + $0x190] sm:$0xff]  ;;  %v62_v2 = vld [vmem:[%s2052_s1 + $0x198] sm:$0xff] }
  0x99   :  { %752 = vst [vmem:[%s2053_s2 + $0xa0] sm:$0xff] %v607_v3  ;;  %753 = vst.msk [vmem:[%s2053_s2 + $0xa8] sm:$0xff] %vm732_vm0, %v608_v4  ;;  %v295_v9 = vpop.permute.xlu1 %294  ;;  %v290_v10 = vpop.permute.xlu0 %289  ;;  %v59_v3 = vld [vmem:[%s2052_s1 + $0x180] sm:$0xff]  ;;  %v60_v4 = vld [vmem:[%s2052_s1 + $0x188] sm:$0xff] }
  0x9a   :  { %v613_v11 = vmul.f32 %v295_v9, %v37_v5  ;;  %v614_v12 = vmul.f32 %v295_v9, %v38_v6  ;;  %v611_v13 = vmul.f32 %v290_v10, %v35_v7  ;;  %v612_v14 = vmul.f32 %v290_v10, %v36_v8 }
  0x9c   :  { %758 = vst [vmem:[%s2053_s2 + $0xd0] sm:$0xff] %v613_v11  ;;  %759 = vst.msk [vmem:[%s2053_s2 + $0xd8] sm:$0xff] %vm732_vm0, %v614_v12  ;;  %v65_v11 = vld [vmem:[%s2052_s1 + $0x1b0] sm:$0xff]  ;;  %v66_v12 = vld [vmem:[%s2052_s1 + $0x1b8] sm:$0xff] }
  0x9d   :  { %756 = vst [vmem:[%s2053_s2 + $0xc0] sm:$0xff] %v611_v13  ;;  %757 = vst.msk [vmem:[%s2053_s2 + $0xc8] sm:$0xff] %vm732_vm0, %v612_v14  ;;  %v305_v19 = vpop.permute.xlu1 %304  ;;  %v300_v20 = vpop.permute.xlu0 %299  ;;  %v63_v13 = vld [vmem:[%s2052_s1 + $0x1a0] sm:$0xff]  ;;  %v64_v14 = vld [vmem:[%s2052_s1 + $0x1a8] sm:$0xff] }
  0x9e   :  { %v617_v21 = vmul.f32 %v305_v19, %v41_v15  ;;  %v618_v22 = vmul.f32 %v305_v19, %v42_v16  ;;  %v615_v23 = vmul.f32 %v300_v20, %v39_v17  ;;  %v616_v24 = vmul.f32 %v300_v20, %v40_v18 }
  0xa0   :  { %762 = vst [vmem:[%s2053_s2 + $0xf0] sm:$0xff] %v617_v21  ;;  %763 = vst.msk [vmem:[%s2053_s2 + $0xf8] sm:$0xff] %vm732_vm0, %v618_v22  ;;  %v69_v21 = vld [vmem:[%s2052_s1 + $0x1d0] sm:$0xff]  ;;  %v70_v22 = vld [vmem:[%s2052_s1 + $0x1d8] sm:$0xff] }
  0xa1   :  { %760 = vst [vmem:[%s2053_s2 + $0xe0] sm:$0xff] %v615_v23  ;;  %761 = vst.msk [vmem:[%s2053_s2 + $0xe8] sm:$0xff] %vm732_vm0, %v616_v24  ;;  %v315_v29 = vpop.permute.xlu1 %314  ;;  %v310_v30 = vpop.permute.xlu0 %309  ;;  %v67_v23 = vld [vmem:[%s2052_s1 + $0x1c0] sm:$0xff]  ;;  %v68_v24 = vld [vmem:[%s2052_s1 + $0x1c8] sm:$0xff] }
  0xa2   :  { %v621_v31 = vmul.f32 %v315_v29, %v45_v25  ;;  %v622_v32 = vmul.f32 %v315_v29, %v46_v26  ;;  %v619_v33 = vmul.f32 %v310_v30, %v43_v27  ;;  %v620_v34 = vmul.f32 %v310_v30, %v44_v28 }
  0xa4   :  { %766 = vst [vmem:[%s2053_s2 + $0x110] sm:$0xff] %v621_v31  ;;  %767 = vst.msk [vmem:[%s2053_s2 + $0x118] sm:$0xff] %vm732_vm0, %v622_v32  ;;  %v73_v31 = vld [vmem:[%s2052_s1 + $0x1f0] sm:$0xff]  ;;  %v74_v32 = vld [vmem:[%s2052_s1 + $0x1f8] sm:$0xff] }
  0xa5   :  { %764 = vst [vmem:[%s2053_s2 + $0x100] sm:$0xff] %v619_v33  ;;  %765 = vst.msk [vmem:[%s2053_s2 + $0x108] sm:$0xff] %vm732_vm0, %v620_v34  ;;  %v325_v39 = vpop.permute.xlu1 %324  ;;  %v320_v40 = vpop.permute.xlu0 %319  ;;  %v71_v33 = vld [vmem:[%s2052_s1 + $0x1e0] sm:$0xff]  ;;  %v72_v34 = vld [vmem:[%s2052_s1 + $0x1e8] sm:$0xff] }
  0xa6   :  { %v625_v41 = vmul.f32 %v325_v39, %v49_v35  ;;  %v626_v42 = vmul.f32 %v325_v39, %v50_v36  ;;  %v623_v43 = vmul.f32 %v320_v40, %v47_v37  ;;  %v624_v44 = vmul.f32 %v320_v40, %v48_v38 }
  0xa8   :  { %770 = vst [vmem:[%s2053_s2 + $0x130] sm:$0xff] %v625_v41  ;;  %771 = vst.msk [vmem:[%s2053_s2 + $0x138] sm:$0xff] %vm732_vm0, %v626_v42  ;;  %v77_v41 = vld [vmem:[%s2052_s1 + $0x210] sm:$0xff]  ;;  %v78_v42 = vld [vmem:[%s2052_s1 + $0x218] sm:$0xff] }
  0xa9   :  { %768 = vst [vmem:[%s2053_s2 + $0x120] sm:$0xff] %v623_v43  ;;  %769 = vst.msk [vmem:[%s2053_s2 + $0x128] sm:$0xff] %vm732_vm0, %v624_v44  ;;  %v335_v49 = vpop.permute.xlu1 %334  ;;  %v330_v50 = vpop.permute.xlu0 %329  ;;  %v75_v43 = vld [vmem:[%s2052_s1 + $0x200] sm:$0xff]  ;;  %v76_v44 = vld [vmem:[%s2052_s1 + $0x208] sm:$0xff] }
  0xaa   :  { %v629_v51 = vmul.f32 %v335_v49, %v53_v45  ;;  %v630_v52 = vmul.f32 %v335_v49, %v54_v46  ;;  %v627_v53 = vmul.f32 %v330_v50, %v51_v47  ;;  %v628_v54 = vmul.f32 %v330_v50, %v52_v48 }
  0xac   :  { %774 = vst [vmem:[%s2053_s2 + $0x150] sm:$0xff] %v629_v51  ;;  %775 = vst.msk [vmem:[%s2053_s2 + $0x158] sm:$0xff] %vm732_vm0, %v630_v52  ;;  %v81_v51 = vld [vmem:[%s2052_s1 + $0x230] sm:$0xff]  ;;  %v82_v52 = vld [vmem:[%s2052_s1 + $0x238] sm:$0xff] }
  0xad   :  { %772 = vst [vmem:[%s2053_s2 + $0x140] sm:$0xff] %v627_v53  ;;  %773 = vst.msk [vmem:[%s2053_s2 + $0x148] sm:$0xff] %vm732_vm0, %v628_v54  ;;  %v345_v59 = vpop.permute.xlu1 %344  ;;  %v340_v60 = vpop.permute.xlu0 %339  ;;  %v79_v53 = vld [vmem:[%s2052_s1 + $0x220] sm:$0xff]  ;;  %v80_v54 = vld [vmem:[%s2052_s1 + $0x228] sm:$0xff] }
  0xae   :  { %v633_v61 = vmul.f32 %v345_v59, %v57_v55  ;;  %v634_v62 = vmul.f32 %v345_v59, %v58_v56  ;;  %v631_v63 = vmul.f32 %v340_v60, %v55_v57  ;;  %v632_v0 = vmul.f32 %v340_v60, %v56_v58 }
  0xb0   :  { %778 = vst [vmem:[%s2053_s2 + $0x170] sm:$0xff] %v633_v61  ;;  %779 = vst.msk [vmem:[%s2053_s2 + $0x178] sm:$0xff] %vm732_vm0, %v634_v62  ;;  %v85_v61 = vld [vmem:[%s2052_s1 + $0x250] sm:$0xff]  ;;  %v86_v62 = vld [vmem:[%s2052_s1 + $0x258] sm:$0xff] }
  0xb1   :  { %776 = vst [vmem:[%s2053_s2 + $0x160] sm:$0xff] %v631_v63  ;;  %777 = vst.msk [vmem:[%s2053_s2 + $0x168] sm:$0xff] %vm732_vm0, %v632_v0  ;;  %v355_v5 = vpop.permute.xlu1 %354  ;;  %v350_v6 = vpop.permute.xlu0 %349  ;;  %v83_v63 = vld [vmem:[%s2052_s1 + $0x240] sm:$0xff]  ;;  %v84_v0 = vld [vmem:[%s2052_s1 + $0x248] sm:$0xff] }
  0xb2   :  { %v637_v7 = vmul.f32 %v355_v5, %v61_v1  ;;  %v638_v8 = vmul.f32 %v355_v5, %v62_v2  ;;  %v635_v9 = vmul.f32 %v350_v6, %v59_v3  ;;  %v636_v10 = vmul.f32 %v350_v6, %v60_v4 }
  0xb4   :  { %782 = vst [vmem:[%s2053_s2 + $0x190] sm:$0xff] %v637_v7  ;;  %783 = vst.msk [vmem:[%s2053_s2 + $0x198] sm:$0xff] %vm732_vm0, %v638_v8  ;;  %v89_v7 = vld [vmem:[%s2052_s1 + $0x270] sm:$0xff]  ;;  %v90_v8 = vld [vmem:[%s2052_s1 + $0x278] sm:$0xff] }
  0xb5   :  { %780 = vst [vmem:[%s2053_s2 + $0x180] sm:$0xff] %v635_v9  ;;  %781 = vst.msk [vmem:[%s2053_s2 + $0x188] sm:$0xff] %vm732_vm0, %v636_v10  ;;  %v365_v15 = vpop.permute.xlu1 %364  ;;  %v360_v16 = vpop.permute.xlu0 %359  ;;  %v87_v9 = vld [vmem:[%s2052_s1 + $0x260] sm:$0xff]  ;;  %v88_v10 = vld [vmem:[%s2052_s1 + $0x268] sm:$0xff] }
  0xb6   :  { %v641_v17 = vmul.f32 %v365_v15, %v65_v11  ;;  %v642_v18 = vmul.f32 %v365_v15, %v66_v12  ;;  %v639_v19 = vmul.f32 %v360_v16, %v63_v13  ;;  %v640_v20 = vmul.f32 %v360_v16, %v64_v14 }
  0xb8   :  { %786 = vst [vmem:[%s2053_s2 + $0x1b0] sm:$0xff] %v641_v17  ;;  %787 = vst.msk [vmem:[%s2053_s2 + $0x1b8] sm:$0xff] %vm732_vm0, %v642_v18  ;;  %v93_v17 = vld [vmem:[%s2052_s1 + $0x290] sm:$0xff]  ;;  %v94_v18 = vld [vmem:[%s2052_s1 + $0x298] sm:$0xff] }
  0xb9   :  { %784 = vst [vmem:[%s2053_s2 + $0x1a0] sm:$0xff] %v639_v19  ;;  %785 = vst.msk [vmem:[%s2053_s2 + $0x1a8] sm:$0xff] %vm732_vm0, %v640_v20  ;;  %v375_v25 = vpop.permute.xlu1 %374  ;;  %v370_v26 = vpop.permute.xlu0 %369  ;;  %v91_v19 = vld [vmem:[%s2052_s1 + $0x280] sm:$0xff]  ;;  %v92_v20 = vld [vmem:[%s2052_s1 + $0x288] sm:$0xff] }
  0xba   :  { %v645_v27 = vmul.f32 %v375_v25, %v69_v21  ;;  %v646_v28 = vmul.f32 %v375_v25, %v70_v22  ;;  %v643_v29 = vmul.f32 %v370_v26, %v67_v23  ;;  %v644_v30 = vmul.f32 %v370_v26, %v68_v24 }
  0xbc   :  { %790 = vst [vmem:[%s2053_s2 + $0x1d0] sm:$0xff] %v645_v27  ;;  %791 = vst.msk [vmem:[%s2053_s2 + $0x1d8] sm:$0xff] %vm732_vm0, %v646_v28  ;;  %v97_v27 = vld [vmem:[%s2052_s1 + $0x2b0] sm:$0xff]  ;;  %v98_v28 = vld [vmem:[%s2052_s1 + $0x2b8] sm:$0xff] }
  0xbd   :  { %788 = vst [vmem:[%s2053_s2 + $0x1c0] sm:$0xff] %v643_v29  ;;  %789 = vst.msk [vmem:[%s2053_s2 + $0x1c8] sm:$0xff] %vm732_vm0, %v644_v30  ;;  %v385_v35 = vpop.permute.xlu1 %384  ;;  %v380_v36 = vpop.permute.xlu0 %379  ;;  %v95_v29 = vld [vmem:[%s2052_s1 + $0x2a0] sm:$0xff]  ;;  %v96_v30 = vld [vmem:[%s2052_s1 + $0x2a8] sm:$0xff] }
  0xbe   :  { %v649_v37 = vmul.f32 %v385_v35, %v73_v31  ;;  %v650_v38 = vmul.f32 %v385_v35, %v74_v32  ;;  %v647_v39 = vmul.f32 %v380_v36, %v71_v33  ;;  %v648_v40 = vmul.f32 %v380_v36, %v72_v34 }
  0xc0   :  { %794 = vst [vmem:[%s2053_s2 + $0x1f0] sm:$0xff] %v649_v37  ;;  %795 = vst.msk [vmem:[%s2053_s2 + $0x1f8] sm:$0xff] %vm732_vm0, %v650_v38  ;;  %v101_v37 = vld [vmem:[%s2052_s1 + $0x2d0] sm:$0xff]  ;;  %v102_v38 = vld [vmem:[%s2052_s1 + $0x2d8] sm:$0xff] }
  0xc1   :  { %792 = vst [vmem:[%s2053_s2 + $0x1e0] sm:$0xff] %v647_v39  ;;  %793 = vst.msk [vmem:[%s2053_s2 + $0x1e8] sm:$0xff] %vm732_vm0, %v648_v40  ;;  %v395_v45 = vpop.permute.xlu1 %394  ;;  %v390_v46 = vpop.permute.xlu0 %389  ;;  %v99_v39 = vld [vmem:[%s2052_s1 + $0x2c0] sm:$0xff]  ;;  %v100_v40 = vld [vmem:[%s2052_s1 + $0x2c8] sm:$0xff] }
  0xc2   :  { %v653_v47 = vmul.f32 %v395_v45, %v77_v41  ;;  %v654_v48 = vmul.f32 %v395_v45, %v78_v42  ;;  %v651_v49 = vmul.f32 %v390_v46, %v75_v43  ;;  %v652_v50 = vmul.f32 %v390_v46, %v76_v44 }
  0xc4   :  { %798 = vst [vmem:[%s2053_s2 + $0x210] sm:$0xff] %v653_v47  ;;  %799 = vst.msk [vmem:[%s2053_s2 + $0x218] sm:$0xff] %vm732_vm0, %v654_v48  ;;  %v105_v47 = vld [vmem:[%s2052_s1 + $0x2f0] sm:$0xff]  ;;  %v106_v48 = vld [vmem:[%s2052_s1 + $0x2f8] sm:$0xff] }
  0xc5   :  { %796 = vst [vmem:[%s2053_s2 + $0x200] sm:$0xff] %v651_v49  ;;  %797 = vst.msk [vmem:[%s2053_s2 + $0x208] sm:$0xff] %vm732_vm0, %v652_v50  ;;  %v405_v55 = vpop.permute.xlu1 %404  ;;  %v400_v56 = vpop.permute.xlu0 %399  ;;  %v103_v49 = vld [vmem:[%s2052_s1 + $0x2e0] sm:$0xff]  ;;  %v104_v50 = vld [vmem:[%s2052_s1 + $0x2e8] sm:$0xff] }
  0xc6   :  { %v657_v57 = vmul.f32 %v405_v55, %v81_v51  ;;  %v658_v58 = vmul.f32 %v405_v55, %v82_v52  ;;  %v655_v59 = vmul.f32 %v400_v56, %v79_v53  ;;  %v656_v60 = vmul.f32 %v400_v56, %v80_v54 }
  0xc8   :  { %802 = vst [vmem:[%s2053_s2 + $0x230] sm:$0xff] %v657_v57  ;;  %803 = vst.msk [vmem:[%s2053_s2 + $0x238] sm:$0xff] %vm732_vm0, %v658_v58  ;;  %v109_v57 = vld [vmem:[%s2052_s1 + $0x310] sm:$0xff]  ;;  %v110_v58 = vld [vmem:[%s2052_s1 + $0x318] sm:$0xff] }
  0xc9   :  { %800 = vst [vmem:[%s2053_s2 + $0x220] sm:$0xff] %v655_v59  ;;  %801 = vst.msk [vmem:[%s2053_s2 + $0x228] sm:$0xff] %vm732_vm0, %v656_v60  ;;  %v415_v1 = vpop.permute.xlu1 %414  ;;  %v410_v2 = vpop.permute.xlu0 %409  ;;  %v107_v59 = vld [vmem:[%s2052_s1 + $0x300] sm:$0xff]  ;;  %v108_v60 = vld [vmem:[%s2052_s1 + $0x308] sm:$0xff] }
  0xca   :  { %v661_v3 = vmul.f32 %v415_v1, %v85_v61  ;;  %v662_v4 = vmul.f32 %v415_v1, %v86_v62  ;;  %v659_v5 = vmul.f32 %v410_v2, %v83_v63  ;;  %v660_v6 = vmul.f32 %v410_v2, %v84_v0 }
  0xcc   :  { %806 = vst [vmem:[%s2053_s2 + $0x250] sm:$0xff] %v661_v3  ;;  %807 = vst.msk [vmem:[%s2053_s2 + $0x258] sm:$0xff] %vm732_vm0, %v662_v4  ;;  %v113_v3 = vld [vmem:[%s2052_s1 + $0x330] sm:$0xff]  ;;  %v114_v4 = vld [vmem:[%s2052_s1 + $0x338] sm:$0xff] }
  0xcd   :  { %804 = vst [vmem:[%s2053_s2 + $0x240] sm:$0xff] %v659_v5  ;;  %805 = vst.msk [vmem:[%s2053_s2 + $0x248] sm:$0xff] %vm732_vm0, %v660_v6  ;;  %v425_v11 = vpop.permute.xlu1 %424  ;;  %v420_v12 = vpop.permute.xlu0 %419  ;;  %v111_v5 = vld [vmem:[%s2052_s1 + $0x320] sm:$0xff]  ;;  %v112_v6 = vld [vmem:[%s2052_s1 + $0x328] sm:$0xff] }
  0xce   :  { %v665_v13 = vmul.f32 %v425_v11, %v89_v7  ;;  %v666_v14 = vmul.f32 %v425_v11, %v90_v8  ;;  %v663_v15 = vmul.f32 %v420_v12, %v87_v9  ;;  %v664_v16 = vmul.f32 %v420_v12, %v88_v10 }
  0xd0   :  { %810 = vst [vmem:[%s2053_s2 + $0x270] sm:$0xff] %v665_v13  ;;  %811 = vst.msk [vmem:[%s2053_s2 + $0x278] sm:$0xff] %vm732_vm0, %v666_v14  ;;  %v117_v13 = vld [vmem:[%s2052_s1 + $0x350] sm:$0xff]  ;;  %v118_v14 = vld [vmem:[%s2052_s1 + $0x358] sm:$0xff] }
  0xd1   :  { %808 = vst [vmem:[%s2053_s2 + $0x260] sm:$0xff] %v663_v15  ;;  %809 = vst.msk [vmem:[%s2053_s2 + $0x268] sm:$0xff] %vm732_vm0, %v664_v16  ;;  %v435_v21 = vpop.permute.xlu1 %434  ;;  %v430_v22 = vpop.permute.xlu0 %429  ;;  %v115_v15 = vld [vmem:[%s2052_s1 + $0x340] sm:$0xff]  ;;  %v116_v16 = vld [vmem:[%s2052_s1 + $0x348] sm:$0xff] }
  0xd2   :  { %v669_v23 = vmul.f32 %v435_v21, %v93_v17  ;;  %v670_v24 = vmul.f32 %v435_v21, %v94_v18  ;;  %v667_v25 = vmul.f32 %v430_v22, %v91_v19  ;;  %v668_v26 = vmul.f32 %v430_v22, %v92_v20 }
  0xd4   :  { %814 = vst [vmem:[%s2053_s2 + $0x290] sm:$0xff] %v669_v23  ;;  %815 = vst.msk [vmem:[%s2053_s2 + $0x298] sm:$0xff] %vm732_vm0, %v670_v24  ;;  %v121_v23 = vld [vmem:[%s2052_s1 + $0x370] sm:$0xff]  ;;  %v122_v24 = vld [vmem:[%s2052_s1 + $0x378] sm:$0xff] }
  0xd5   :  { %812 = vst [vmem:[%s2053_s2 + $0x280] sm:$0xff] %v667_v25  ;;  %813 = vst.msk [vmem:[%s2053_s2 + $0x288] sm:$0xff] %vm732_vm0, %v668_v26  ;;  %v445_v31 = vpop.permute.xlu1 %444  ;;  %v440_v32 = vpop.permute.xlu0 %439  ;;  %v119_v25 = vld [vmem:[%s2052_s1 + $0x360] sm:$0xff]  ;;  %v120_v26 = vld [vmem:[%s2052_s1 + $0x368] sm:$0xff] }
  0xd6   :  { %v673_v33 = vmul.f32 %v445_v31, %v97_v27  ;;  %v674_v34 = vmul.f32 %v445_v31, %v98_v28  ;;  %v671_v35 = vmul.f32 %v440_v32, %v95_v29  ;;  %v672_v36 = vmul.f32 %v440_v32, %v96_v30 }
  0xd8   :  { %818 = vst [vmem:[%s2053_s2 + $0x2b0] sm:$0xff] %v673_v33  ;;  %819 = vst.msk [vmem:[%s2053_s2 + $0x2b8] sm:$0xff] %vm732_vm0, %v674_v34  ;;  %v125_v33 = vld [vmem:[%s2052_s1 + $0x390] sm:$0xff]  ;;  %v126_v34 = vld [vmem:[%s2052_s1 + $0x398] sm:$0xff] }
  0xd9   :  { %816 = vst [vmem:[%s2053_s2 + $0x2a0] sm:$0xff] %v671_v35  ;;  %817 = vst.msk [vmem:[%s2053_s2 + $0x2a8] sm:$0xff] %vm732_vm0, %v672_v36  ;;  %v455_v41 = vpop.permute.xlu1 %454  ;;  %v450_v42 = vpop.permute.xlu0 %449  ;;  %v123_v35 = vld [vmem:[%s2052_s1 + $0x380] sm:$0xff]  ;;  %v124_v36 = vld [vmem:[%s2052_s1 + $0x388] sm:$0xff] }
  0xda   :  { %v677_v43 = vmul.f32 %v455_v41, %v101_v37  ;;  %v678_v44 = vmul.f32 %v455_v41, %v102_v38  ;;  %v675_v45 = vmul.f32 %v450_v42, %v99_v39  ;;  %v676_v46 = vmul.f32 %v450_v42, %v100_v40 }
  0xdc   :  { %822 = vst [vmem:[%s2053_s2 + $0x2d0] sm:$0xff] %v677_v43  ;;  %823 = vst.msk [vmem:[%s2053_s2 + $0x2d8] sm:$0xff] %vm732_vm0, %v678_v44  ;;  %v129_v43 = vld [vmem:[%s2052_s1 + $0x3b0] sm:$0xff]  ;;  %v130_v44 = vld [vmem:[%s2052_s1 + $0x3b8] sm:$0xff] }
  0xdd   :  { %820 = vst [vmem:[%s2053_s2 + $0x2c0] sm:$0xff] %v675_v45  ;;  %821 = vst.msk [vmem:[%s2053_s2 + $0x2c8] sm:$0xff] %vm732_vm0, %v676_v46  ;;  %v465_v51 = vpop.permute.xlu1 %464  ;;  %v460_v52 = vpop.permute.xlu0 %459  ;;  %v127_v45 = vld [vmem:[%s2052_s1 + $0x3a0] sm:$0xff]  ;;  %v128_v46 = vld [vmem:[%s2052_s1 + $0x3a8] sm:$0xff] }
  0xde   :  { %v681_v53 = vmul.f32 %v465_v51, %v105_v47  ;;  %v682_v54 = vmul.f32 %v465_v51, %v106_v48  ;;  %v679_v55 = vmul.f32 %v460_v52, %v103_v49  ;;  %v680_v56 = vmul.f32 %v460_v52, %v104_v50 }
  0xe0   :  { %826 = vst [vmem:[%s2053_s2 + $0x2f0] sm:$0xff] %v681_v53  ;;  %827 = vst.msk [vmem:[%s2053_s2 + $0x2f8] sm:$0xff] %vm732_vm0, %v682_v54  ;;  %v133_v53 = vld [vmem:[%s2052_s1 + $0x3d0] sm:$0xff]  ;;  %v134_v54 = vld [vmem:[%s2052_s1 + $0x3d8] sm:$0xff] }
  0xe1   :  { %824 = vst [vmem:[%s2053_s2 + $0x2e0] sm:$0xff] %v679_v55  ;;  %825 = vst.msk [vmem:[%s2053_s2 + $0x2e8] sm:$0xff] %vm732_vm0, %v680_v56  ;;  %v475_v61 = vpop.permute.xlu1 %474  ;;  %v470_v62 = vpop.permute.xlu0 %469  ;;  %v131_v55 = vld [vmem:[%s2052_s1 + $0x3c0] sm:$0xff]  ;;  %v132_v56 = vld [vmem:[%s2052_s1 + $0x3c8] sm:$0xff] }
  0xe2   :  { %v685_v63 = vmul.f32 %v475_v61, %v109_v57  ;;  %v686_v0 = vmul.f32 %v475_v61, %v110_v58  ;;  %v683_v1 = vmul.f32 %v470_v62, %v107_v59  ;;  %v684_v2 = vmul.f32 %v470_v62, %v108_v60 }
  0xe4   :  { %830 = vst [vmem:[%s2053_s2 + $0x310] sm:$0xff] %v685_v63  ;;  %831 = vst.msk [vmem:[%s2053_s2 + $0x318] sm:$0xff] %vm732_vm0, %v686_v0  ;;  %v137_v63 = vld [vmem:[%s2052_s1 + $0x3f0] sm:$0xff]  ;;  %v138_v0 = vld [vmem:[%s2052_s1 + $0x3f8] sm:$0xff] }
  0xe5   :  { %828 = vst [vmem:[%s2053_s2 + $0x300] sm:$0xff] %v683_v1  ;;  %829 = vst.msk [vmem:[%s2053_s2 + $0x308] sm:$0xff] %vm732_vm0, %v684_v2  ;;  %v485_v7 = vpop.permute.xlu1 %484  ;;  %v480_v8 = vpop.permute.xlu0 %479  ;;  %v135_v1 = vld [vmem:[%s2052_s1 + $0x3e0] sm:$0xff]  ;;  %v136_v2 = vld [vmem:[%s2052_s1 + $0x3e8] sm:$0xff] }
  0xe6   :  { %v689_v9 = vmul.f32 %v485_v7, %v113_v3  ;;  %v690_v10 = vmul.f32 %v485_v7, %v114_v4  ;;  %v687_v11 = vmul.f32 %v480_v8, %v111_v5  ;;  %v688_v12 = vmul.f32 %v480_v8, %v112_v6 }
  0xe8   :  { %834 = vst [vmem:[%s2053_s2 + $0x330] sm:$0xff] %v689_v9  ;;  %835 = vst.msk [vmem:[%s2053_s2 + $0x338] sm:$0xff] %vm732_vm0, %v690_v10  ;;  %v141_v9 = vld [vmem:[%s2052_s1 + $0x410] sm:$0xff]  ;;  %v142_v10 = vld [vmem:[%s2052_s1 + $0x418] sm:$0xff] }
  0xe9   :  { %832 = vst [vmem:[%s2053_s2 + $0x320] sm:$0xff] %v687_v11  ;;  %833 = vst.msk [vmem:[%s2053_s2 + $0x328] sm:$0xff] %vm732_vm0, %v688_v12  ;;  %v495_v17 = vpop.permute.xlu1 %494  ;;  %v490_v18 = vpop.permute.xlu0 %489  ;;  %v139_v11 = vld [vmem:[%s2052_s1 + $0x400] sm:$0xff]  ;;  %v140_v12 = vld [vmem:[%s2052_s1 + $0x408] sm:$0xff] }
  0xea   :  { %v693_v19 = vmul.f32 %v495_v17, %v117_v13  ;;  %v694_v20 = vmul.f32 %v495_v17, %v118_v14  ;;  %v691_v21 = vmul.f32 %v490_v18, %v115_v15  ;;  %v692_v22 = vmul.f32 %v490_v18, %v116_v16 }
  0xec   :  { %838 = vst [vmem:[%s2053_s2 + $0x350] sm:$0xff] %v693_v19  ;;  %839 = vst.msk [vmem:[%s2053_s2 + $0x358] sm:$0xff] %vm732_vm0, %v694_v20  ;;  %v145_v19 = vld [vmem:[%s2052_s1 + $0x430] sm:$0xff]  ;;  %v146_v20 = vld [vmem:[%s2052_s1 + $0x438] sm:$0xff] }
  0xed   :  { %836 = vst [vmem:[%s2053_s2 + $0x340] sm:$0xff] %v691_v21  ;;  %837 = vst.msk [vmem:[%s2053_s2 + $0x348] sm:$0xff] %vm732_vm0, %v692_v22  ;;  %v505_v27 = vpop.permute.xlu1 %504  ;;  %v500_v28 = vpop.permute.xlu0 %499  ;;  %v143_v21 = vld [vmem:[%s2052_s1 + $0x420] sm:$0xff]  ;;  %v144_v22 = vld [vmem:[%s2052_s1 + $0x428] sm:$0xff] }
  0xee   :  { %v697_v29 = vmul.f32 %v505_v27, %v121_v23  ;;  %v698_v30 = vmul.f32 %v505_v27, %v122_v24  ;;  %v695_v31 = vmul.f32 %v500_v28, %v119_v25  ;;  %v696_v32 = vmul.f32 %v500_v28, %v120_v26 }
  0xf0   :  { %842 = vst [vmem:[%s2053_s2 + $0x370] sm:$0xff] %v697_v29  ;;  %843 = vst.msk [vmem:[%s2053_s2 + $0x378] sm:$0xff] %vm732_vm0, %v698_v30  ;;  %v149_v29 = vld [vmem:[%s2052_s1 + $0x450] sm:$0xff]  ;;  %v150_v30 = vld [vmem:[%s2052_s1 + $0x458] sm:$0xff] }
  0xf1   :  { %840 = vst [vmem:[%s2053_s2 + $0x360] sm:$0xff] %v695_v31  ;;  %841 = vst.msk [vmem:[%s2053_s2 + $0x368] sm:$0xff] %vm732_vm0, %v696_v32  ;;  %v515_v37 = vpop.permute.xlu1 %514  ;;  %v510_v38 = vpop.permute.xlu0 %509  ;;  %v147_v31 = vld [vmem:[%s2052_s1 + $0x440] sm:$0xff]  ;;  %v148_v32 = vld [vmem:[%s2052_s1 + $0x448] sm:$0xff] }
  0xf2   :  { %v701_v39 = vmul.f32 %v515_v37, %v125_v33  ;;  %v702_v40 = vmul.f32 %v515_v37, %v126_v34  ;;  %v699_v41 = vmul.f32 %v510_v38, %v123_v35  ;;  %v700_v42 = vmul.f32 %v510_v38, %v124_v36 }
  0xf4   :  { %846 = vst [vmem:[%s2053_s2 + $0x390] sm:$0xff] %v701_v39  ;;  %847 = vst.msk [vmem:[%s2053_s2 + $0x398] sm:$0xff] %vm732_vm0, %v702_v40  ;;  %v153_v39 = vld [vmem:[%s2052_s1 + $0x470] sm:$0xff]  ;;  %v154_v40 = vld [vmem:[%s2052_s1 + $0x478] sm:$0xff] }
  0xf5   :  { %844 = vst [vmem:[%s2053_s2 + $0x380] sm:$0xff] %v699_v41  ;;  %845 = vst.msk [vmem:[%s2053_s2 + $0x388] sm:$0xff] %vm732_vm0, %v700_v42  ;;  %v525_v47 = vpop.permute.xlu1 %524  ;;  %v520_v48 = vpop.permute.xlu0 %519  ;;  %v151_v41 = vld [vmem:[%s2052_s1 + $0x460] sm:$0xff]  ;;  %v152_v42 = vld [vmem:[%s2052_s1 + $0x468] sm:$0xff] }
  0xf6   :  { %v705_v49 = vmul.f32 %v525_v47, %v129_v43  ;;  %v706_v50 = vmul.f32 %v525_v47, %v130_v44  ;;  %v703_v51 = vmul.f32 %v520_v48, %v127_v45  ;;  %v704_v52 = vmul.f32 %v520_v48, %v128_v46 }
  0xf8   :  { %850 = vst [vmem:[%s2053_s2 + $0x3b0] sm:$0xff] %v705_v49  ;;  %851 = vst.msk [vmem:[%s2053_s2 + $0x3b8] sm:$0xff] %vm732_vm0, %v706_v50 }
  0xf9   :  { %848 = vst [vmem:[%s2053_s2 + $0x3a0] sm:$0xff] %v703_v51  ;;  %849 = vst.msk [vmem:[%s2053_s2 + $0x3a8] sm:$0xff] %vm732_vm0, %v704_v52  ;;  %v535_v57 = vpop.permute.xlu1 %534  ;;  %v530_v58 = vpop.permute.xlu0 %529 }
  0xfa   :  { %v709_v59 = vmul.f32 %v535_v57, %v133_v53  ;;  %v710_v60 = vmul.f32 %v535_v57, %v134_v54  ;;  %v707_v61 = vmul.f32 %v530_v58, %v131_v55  ;;  %v708_v62 = vmul.f32 %v530_v58, %v132_v56 }
  0xfc   :  { %854 = vst [vmem:[%s2053_s2 + $0x3d0] sm:$0xff] %v709_v59  ;;  %855 = vst.msk [vmem:[%s2053_s2 + $0x3d8] sm:$0xff] %vm732_vm0, %v710_v60 }
  0xfd   :  { %852 = vst [vmem:[%s2053_s2 + $0x3c0] sm:$0xff] %v707_v61  ;;  %853 = vst.msk [vmem:[%s2053_s2 + $0x3c8] sm:$0xff] %vm732_vm0, %v708_v62  ;;  %v545_v3 = vpop.permute.xlu1 %544  ;;  %v540_v4 = vpop.permute.xlu0 %539 }
  0xfe   :  { %v713_v5 = vmul.f32 %v545_v3, %v137_v63  ;;  %v714_v6 = vmul.f32 %v545_v3, %v138_v0  ;;  %v711_v7 = vmul.f32 %v540_v4, %v135_v1  ;;  %v712_v8 = vmul.f32 %v540_v4, %v136_v2 }
 0x100   :  { %858 = vst [vmem:[%s2053_s2 + $0x3f0] sm:$0xff] %v713_v5  ;;  %859 = vst.msk [vmem:[%s2053_s2 + $0x3f8] sm:$0xff] %vm732_vm0, %v714_v6 }
 0x101   :  { %856 = vst [vmem:[%s2053_s2 + $0x3e0] sm:$0xff] %v711_v7  ;;  %857 = vst.msk [vmem:[%s2053_s2 + $0x3e8] sm:$0xff] %vm732_vm0, %v712_v8  ;;  %v555_v13 = vpop.permute.xlu1 %554 }
 0x102   :  { %v717_v14 = vmul.f32 %v555_v13, %v141_v9  ;;  %v718_v15 = vmul.f32 %v555_v13, %v142_v10  ;;  %v550_v16 = vpop.permute.xlu0 %549 }
 0x103   :  { %v715_v17 = vmul.f32 %v550_v16, %v139_v11  ;;  %v716_v18 = vmul.f32 %v550_v16, %v140_v12 }
 0x104   :  { %862 = vst [vmem:[%s2053_s2 + $0x410] sm:$0xff] %v717_v14  ;;  %863 = vst.msk [vmem:[%s2053_s2 + $0x418] sm:$0xff] %vm732_vm0, %v718_v15 }
 0x105   :  { %860 = vst [vmem:[%s2053_s2 + $0x400] sm:$0xff] %v715_v17  ;;  %861 = vst.msk [vmem:[%s2053_s2 + $0x408] sm:$0xff] %vm732_vm0, %v716_v18  ;;  %v565_v23 = vpop.permute.xlu1 %564 }
 0x106   :  { %v721_v24 = vmul.f32 %v565_v23, %v145_v19  ;;  %v722_v25 = vmul.f32 %v565_v23, %v146_v20  ;;  %v560_v26 = vpop.permute.xlu0 %559 }
 0x107   :  { %v719_v27 = vmul.f32 %v560_v26, %v143_v21  ;;  %v720_v28 = vmul.f32 %v560_v26, %v144_v22 }
 0x108   :  { %866 = vst [vmem:[%s2053_s2 + $0x430] sm:$0xff] %v721_v24  ;;  %867 = vst.msk [vmem:[%s2053_s2 + $0x438] sm:$0xff] %vm732_vm0, %v722_v25 }
 0x109   :  { %864 = vst [vmem:[%s2053_s2 + $0x420] sm:$0xff] %v719_v27  ;;  %865 = vst.msk [vmem:[%s2053_s2 + $0x428] sm:$0xff] %vm732_vm0, %v720_v28  ;;  %v575_v33 = vpop.permute.xlu1 %574 }
 0x10a   :  { %v725_v34 = vmul.f32 %v575_v33, %v149_v29  ;;  %v726_v35 = vmul.f32 %v575_v33, %v150_v30  ;;  %v570_v36 = vpop.permute.xlu0 %569 }
 0x10b   :  { %v723_v37 = vmul.f32 %v570_v36, %v147_v31  ;;  %v724_v38 = vmul.f32 %v570_v36, %v148_v32 }
 0x10c   :  { %870 = vst [vmem:[%s2053_s2 + $0x450] sm:$0xff] %v725_v34  ;;  %871 = vst.msk [vmem:[%s2053_s2 + $0x458] sm:$0xff] %vm732_vm0, %v726_v35 }
 0x10d   :  { %868 = vst [vmem:[%s2053_s2 + $0x440] sm:$0xff] %v723_v37  ;;  %869 = vst.msk [vmem:[%s2053_s2 + $0x448] sm:$0xff] %vm732_vm0, %v724_v38  ;;  %v585_v43 = vpop.permute.xlu1 %584 }
 0x10e   :  { %v729_v44 = vmul.f32 %v585_v43, %v153_v39  ;;  %v730_v45 = vmul.f32 %v585_v43, %v154_v40  ;;  %v580_v46 = vpop.permute.xlu0 %579 }
 0x10f   :  { %v727_v47 = vmul.f32 %v580_v46, %v151_v41  ;;  %v728_v48 = vmul.f32 %v580_v46, %v152_v42 }
 0x110   :  { %874 = vst [vmem:[%s2053_s2 + $0x470] sm:$0xff] %v729_v44  ;;  %875 = vst.msk [vmem:[%s2053_s2 + $0x478] sm:$0xff] %vm732_vm0, %v730_v45 }
 0x111   :  { %872 = vst [vmem:[%s2053_s2 + $0x460] sm:$0xff] %v727_v47  ;;  %873 = vst.msk [vmem:[%s2053_s2 + $0x468] sm:$0xff] %vm732_vm0, %v728_v48 }

</bundles_post_ra>
